<compile_context>
chip_gen: v5e
topology: v5e:2x2
jax: 0.10.0
libtpu: 0.0.40
codegen_flags: <defaults>
</compile_context>

<pallas_src>
import functools

import jax
import jax.numpy as jnp
from jax.experimental import pallas as pl
from jax.experimental.pallas import tpu as pltpu

INPUT_SIZE = 200
HIDDEN = (124, 32)
HIDDEN0_PAD = 128                 # 124 zero-padded to a full lane width
OUTPUT_SIZE = 3
TILE_B = 4096                     # batch rows per grid step (multiple of 8)
VMEM_LIMIT_BYTES = 48 * 1024 * 1024   # < v7x 64 MiB physical; plenty on v5e/v6e


def adv_classifier_kernel(x_ref, w1_ref, b1_ref, w2_ref, b2_ref,
                          w3_ref, b3_ref, out_ref):
    # x_ref: (tile_b, 200) f32 (native dtype, cast in-kernel); weights bf16;
    # biases f32.
    x = x_ref[...].astype(jnp.bfloat16)

    # fc1 + relu (f32 accumulation, f32 elementwise)
    h1 = jnp.dot(x, w1_ref[...], preferred_element_type=jnp.float32) + b1_ref[...]
    h1 = jnp.maximum(h1, 0.0)
    # dropout -> identity (eval)

    # fc2 + relu
    h2 = jnp.dot(h1.astype(jnp.bfloat16), w2_ref[...],
                 preferred_element_type=jnp.float32) + b2_ref[...]
    h2 = jnp.maximum(h2, 0.0)
    # dropout -> identity (eval)

    # fc3
    z = jnp.dot(h2.astype(jnp.bfloat16), w3_ref[...],
                preferred_element_type=jnp.float32) + b3_ref[...]

    # log_softmax along dim=1 (numerically stable), all in f32
    m = jnp.max(z, axis=1, keepdims=True)
    lse = m + jnp.log(jnp.sum(jnp.exp(z - m), axis=1, keepdims=True))
    out_ref[...] = (z - lse).astype(out_ref.dtype)


def _round_up(n, m):
    return pl.cdiv(n, m) * m


def _prep_params(params):
    """Pad hidden dim 124 -> 128 with zeros (exact) and cast for streaming."""
    w1, b1, w2, b2, w3, b3 = params
    pad = HIDDEN0_PAD - HIDDEN[0]
    w1p = jnp.pad(w1, ((0, 0), (0, pad))).astype(jnp.bfloat16)   # (200, 128)
    b1p = jnp.pad(b1, ((0, 0), (0, pad))).astype(jnp.float32)    # (1, 128)
    w2p = jnp.pad(w2, ((0, pad), (0, 0))).astype(jnp.bfloat16)   # (128, 32)
    b2p = b2.astype(jnp.float32)                                 # (1, 32)
    w3p = w3.astype(jnp.bfloat16)                                # (32, 3)
    b3p = b3.astype(jnp.float32)                                 # (1, 3)
    return w1p, b1p, w2p, b2p, w3p, b3p


@functools.partial(jax.jit, static_argnames=("tile_b",))
def adversarial_classifier_forward(x, params, tile_b=TILE_B):
    """x: any shape whose trailing elements flatten to (-1, INPUT_SIZE)."""
    x2d = x.reshape(-1, INPUT_SIZE)   # metadata-only reshape (no HBM copy)
    b = x2d.shape[0]

    # Tile rows: multiple of 8 (f32 sublane), no larger than needed.  The last
    # (possibly partial) block is handled by Pallas: OOB reads never cross row
    # boundaries into the math (no cross-row reductions) and OOB writes are
    # masked, so x is never padded or copied in the wrapper.
    tb = int(min(tile_b, _round_up(b, 8)))
    grid = (pl.cdiv(b, tb),)

    w1, b1, w2, b2, w3, b3 = _prep_params(params)

    flops = 2 * b * (INPUT_SIZE * HIDDEN0_PAD
                     + HIDDEN0_PAD * HIDDEN[1]
                     + HIDDEN[1] * OUTPUT_SIZE)
    param_bytes = sum(int(p.size) * p.dtype.itemsize
                      for p in (w1, b1, w2, b2, w3, b3))
    bytes_accessed = b * (INPUT_SIZE * 4 + OUTPUT_SIZE * 4) + param_bytes

    out = pl.pallas_call(
        adv_classifier_kernel,
        out_shape=jax.ShapeDtypeStruct((b, OUTPUT_SIZE), jnp.float32),
        grid=grid,
        in_specs=[
            # activation: one batch tile per grid step (pipelined DMA)
            pl.BlockSpec((tb, INPUT_SIZE), lambda i: (i, 0)),
            # parameters: constant block index -> DMA'd once, VMEM-resident
            pl.BlockSpec((INPUT_SIZE, HIDDEN0_PAD), lambda i: (0, 0)),
            pl.BlockSpec((1, HIDDEN0_PAD), lambda i: (0, 0)),
            pl.BlockSpec((HIDDEN0_PAD, HIDDEN[1]), lambda i: (0, 0)),
            pl.BlockSpec((1, HIDDEN[1]), lambda i: (0, 0)),
            pl.BlockSpec((HIDDEN[1], OUTPUT_SIZE), lambda i: (0, 0)),
            pl.BlockSpec((1, OUTPUT_SIZE), lambda i: (0, 0)),
        ],
        out_specs=pl.BlockSpec((tb, OUTPUT_SIZE), lambda i: (i, 0)),
        compiler_params=pltpu.CompilerParams(
            dimension_semantics=("parallel",),
            vmem_limit_bytes=VMEM_LIMIT_BYTES),
        cost_estimate=pl.CostEstimate(
            flops=flops,
            transcendentals=4 * b,              # exp x3 + log per row
            bytes_accessed=bytes_accessed),
    )(x2d, w1, b1, w2, b2, w3, b3)

    return out


def _xavier_uniform(key, fan_in, fan_out):
    # PyTorch nn.init.xavier_uniform_ on weight of shape (out, in):
    # bound = sqrt(6 / (fan_in + fan_out)).  Stored transposed as [in, out].
    bound = (6.0 / (fan_in + fan_out)) ** 0.5
    return jax.random.uniform(key, (fan_in, fan_out), jnp.float32, -bound, bound)


def _linear_bias(key, fan_in, fan_out):
    # PyTorch nn.Linear default bias init: U(-1/sqrt(fan_in), 1/sqrt(fan_in)).
    bound = 1.0 / (fan_in ** 0.5)
    return jax.random.uniform(key, (1, fan_out), jnp.float32, -bound, bound)


def init_params(key):
    k1, k2, k3, k4, k5, k6 = jax.random.split(key, 6)
    w1 = _xavier_uniform(k1, INPUT_SIZE, HIDDEN[0])
    b1 = _linear_bias(k2, INPUT_SIZE, HIDDEN[0])
    w2 = _xavier_uniform(k3, HIDDEN[0], HIDDEN[1])
    b2 = _linear_bias(k4, HIDDEN[0], HIDDEN[1])
    w3 = _xavier_uniform(k5, HIDDEN[1], OUTPUT_SIZE)
    b3 = _linear_bias(k6, HIDDEN[1], OUTPUT_SIZE)
    return (w1, b1, w2, b2, w3, b3)


def _reference_forward(x, params):
    """Pure-JAX reference with matching bf16 matmul inputs / f32 accumulation.

    Note: bf16 weight/activation streaming is a deliberate precision tradeoff
    vs the f32 PyTorch module (validated separately to be ~1e-2 on log-probs).
    """
    w1, b1, w2, b2, w3, b3 = _prep_params(params)
    x2d = x.reshape(-1, INPUT_SIZE).astype(jnp.bfloat16)
    h1 = jnp.maximum(
        jnp.dot(x2d, w1, preferred_element_type=jnp.float32) + b1, 0.0)
    h2 = jnp.maximum(
        jnp.dot(h1.astype(jnp.bfloat16), w2,
                preferred_element_type=jnp.float32) + b2, 0.0)
    z = jnp.dot(h2.astype(jnp.bfloat16), w3,
                preferred_element_type=jnp.float32) + b3
    return jax.nn.log_softmax(z, axis=1)


if __name__ == "__main__":
    key = jax.random.PRNGKey(0)
    pkey, xkey = jax.random.split(key)
    params = init_params(pkey)

    # Small input: (2, 4, 200) -> view(-1, 200) -> (8, 200)
    x = jax.random.normal(xkey, (2, 4, INPUT_SIZE), dtype=jnp.float32)

    log_probs = adversarial_classifier_forward(x, params)
    jax.block_until_ready(log_probs)

    assert log_probs.shape == (8, OUTPUT_SIZE)

    # sanity 1: rows of log-softmax exponentiate & sum to 1
    row_sums = jnp.sum(jnp.exp(log_probs), axis=1)
    assert bool(jnp.all(jnp.abs(row_sums - 1.0) < 1e-3))

    # sanity 2: match the pure-JAX reference
    ref = _reference_forward(x, params)
    assert bool(jnp.all(jnp.abs(log_probs - ref) < 2e-2))

    print("KERNEL_OK")
</pallas_src>

<mosaic_0001>
module attributes {stable_mosaic.version = 11 : i64} {
  func.func @adv_classifier_kernel(%arg0: i32, %arg1: memref<8x200xf32, #tpu.memory_space<vmem>>, %arg2: memref<200x128xbf16, #tpu.memory_space<vmem>>, %arg3: memref<1x128xf32, #tpu.memory_space<vmem>>, %arg4: memref<128x32xbf16, #tpu.memory_space<vmem>>, %arg5: memref<1x32xf32, #tpu.memory_space<vmem>>, %arg6: memref<32x3xbf16, #tpu.memory_space<vmem>>, %arg7: memref<1x3xf32, #tpu.memory_space<vmem>>, %arg8: memref<8x3xf32, #tpu.memory_space<vmem>>) attributes {dimension_semantics = [#tpu.dimension_semantics<parallel>], iteration_bounds = array<i64: 1>, scalar_prefetch = 0 : i64, scratch_operands = 0 : i64, tpu.core_type = #tpu.core_type<tc>, window_params = [{transform_indices = @transform_0, window_bounds = array<i64: 8, 200>}, {pipeline_mode = #tpu.pipeline_mode<synchronous>, transform_indices = @transform_1, window_bounds = array<i64: 200, 128>}, {pipeline_mode = #tpu.pipeline_mode<synchronous>, transform_indices = @transform_2, window_bounds = array<i64: 1, 128>}, {pipeline_mode = #tpu.pipeline_mode<synchronous>, transform_indices = @transform_3, window_bounds = array<i64: 128, 32>}, {pipeline_mode = #tpu.pipeline_mode<synchronous>, transform_indices = @transform_4, window_bounds = array<i64: 1, 32>}, {pipeline_mode = #tpu.pipeline_mode<synchronous>, transform_indices = @transform_5, window_bounds = array<i64: 32, 3>}, {pipeline_mode = #tpu.pipeline_mode<synchronous>, transform_indices = @transform_6, window_bounds = array<i64: 1, 3>}, {transform_indices = @transform_7, window_bounds = array<i64: 8, 3>}]} {
    %c0 = arith.constant 0 : index
    %c0_0 = arith.constant 0 : index
    %0 = vector.load %arg1[%c0, %c0_0] : memref<8x200xf32, #tpu.memory_space<vmem>>, vector<8x200xf32>
    %1 = arith.truncf %0 : vector<8x200xf32> to vector<8x200xbf16>
    %c0_1 = arith.constant 0 : index
    %c0_2 = arith.constant 0 : index
    %2 = vector.load %arg2[%c0_1, %c0_2] : memref<200x128xbf16, #tpu.memory_space<vmem>>, vector<200x128xbf16>
    %cst = arith.constant dense<0.000000e+00> : vector<8x128xf32>
    %3 = tpu.matmul %1, %2, %cst {dimension_numbers = #tpu.dot_dimension_numbers<[1], [0], [0], [1], [0, 0, 1, 1], [], []>} : vector<8x200xbf16>, vector<200x128xbf16>, vector<8x128xf32> -> vector<8x128xf32>
    %c0_3 = arith.constant 0 : index
    %c0_4 = arith.constant 0 : index
    %4 = vector.load %arg3[%c0_3, %c0_4] : memref<1x128xf32, #tpu.memory_space<vmem>>, vector<1x128xf32>
    %5 = vector.broadcast %4 : vector<1x128xf32> to vector<8x128xf32>
    %6 = arith.addf %3, %5 : vector<8x128xf32>
    %cst_5 = arith.constant 0.000000e+00 : f32
    %7 = vector.broadcast %cst_5 : f32 to vector<8x128xf32>
    %8 = arith.maximumf %6, %7 : vector<8x128xf32>
    %9 = arith.truncf %8 : vector<8x128xf32> to vector<8x128xbf16>
    %c0_6 = arith.constant 0 : index
    %c0_7 = arith.constant 0 : index
    %10 = vector.load %arg4[%c0_6, %c0_7] : memref<128x32xbf16, #tpu.memory_space<vmem>>, vector<128x32xbf16>
    %cst_8 = arith.constant dense<0.000000e+00> : vector<8x32xf32>
    %11 = tpu.matmul %9, %10, %cst_8 {dimension_numbers = #tpu.dot_dimension_numbers<[1], [0], [0], [1], [0, 0, 1, 1], [], []>} : vector<8x128xbf16>, vector<128x32xbf16>, vector<8x32xf32> -> vector<8x32xf32>
    %c0_9 = arith.constant 0 : index
    %c0_10 = arith.constant 0 : index
    %12 = vector.load %arg5[%c0_9, %c0_10] : memref<1x32xf32, #tpu.memory_space<vmem>>, vector<1x32xf32>
    %13 = vector.broadcast %12 : vector<1x32xf32> to vector<8x32xf32>
    %14 = arith.addf %11, %13 : vector<8x32xf32>
    %cst_11 = arith.constant 0.000000e+00 : f32
    %15 = vector.broadcast %cst_11 : f32 to vector<8x32xf32>
    %16 = arith.maximumf %14, %15 : vector<8x32xf32>
    %17 = arith.truncf %16 : vector<8x32xf32> to vector<8x32xbf16>
    %c0_12 = arith.constant 0 : index
    %c0_13 = arith.constant 0 : index
    %18 = vector.load %arg6[%c0_12, %c0_13] : memref<32x3xbf16, #tpu.memory_space<vmem>>, vector<32x3xbf16>
    %cst_14 = arith.constant dense<0.000000e+00> : vector<8x3xf32>
    %19 = tpu.matmul %17, %18, %cst_14 {dimension_numbers = #tpu.dot_dimension_numbers<[1], [0], [0], [1], [0, 0, 1, 1], [], []>} : vector<8x32xbf16>, vector<32x3xbf16>, vector<8x3xf32> -> vector<8x3xf32>
    %c0_15 = arith.constant 0 : index
    %c0_16 = arith.constant 0 : index
    %20 = vector.load %arg7[%c0_15, %c0_16] : memref<1x3xf32, #tpu.memory_space<vmem>>, vector<1x3xf32>
    %21 = vector.broadcast %20 : vector<1x3xf32> to vector<8x3xf32>
    %22 = arith.addf %19, %21 : vector<8x3xf32>
    %cst_17 = arith.constant dense<0xFF800000> : vector<8xf32>
    %23 = vector.multi_reduction <maximumf>, %22, %cst_17 [1] : vector<8x3xf32> to vector<8xf32>
    %24 = vector.shape_cast %23 : vector<8xf32> to vector<8x1xf32>
    %25 = vector.broadcast %24 : vector<8x1xf32> to vector<8x3xf32>
    %26 = arith.subf %22, %25 : vector<8x3xf32>
    %27 = math.exp %26 : vector<8x3xf32>
    %cst_18 = arith.constant dense<0.000000e+00> : vector<8xf32>
    %28 = vector.multi_reduction <add>, %27, %cst_18 [1] : vector<8x3xf32> to vector<8xf32>
    %29 = vector.shape_cast %28 : vector<8xf32> to vector<8x1xf32>
    %30 = math.log %29 : vector<8x1xf32>
    %31 = arith.addf %24, %30 : vector<8x1xf32>
    %32 = vector.broadcast %31 : vector<8x1xf32> to vector<8x3xf32>
    %33 = arith.subf %22, %32 : vector<8x3xf32>
    %c0_19 = arith.constant 0 : index
    %c0_20 = arith.constant 0 : index
    %34 = vector.load %arg8[%c0_19, %c0_20] : memref<8x3xf32, #tpu.memory_space<vmem>>, vector<8x3xf32>
    tpu.vector_store %arg8[%c0_19, %c0_20], %33 {strides = array<i32>} : memref<8x3xf32, #tpu.memory_space<vmem>>, vector<8x3xf32>,
    return
  }
  func.func @transform_0(%arg0: i32) -> (i32, i32) {
    %c0_i32 = arith.constant 0 : i32
    %c0_i32_0 = arith.constant 0 : i32
    return %arg0, %c0_i32 : i32, i32
  }
  func.func @transform_1(%arg0: i32) -> (i32, i32) {
    %c0_i32 = arith.constant 0 : i32
    %c0_i32_0 = arith.constant 0 : i32
    %c0_i32_1 = arith.constant 0 : i32
    return %c0_i32, %c0_i32_0 : i32, i32
  }
  func.func @transform_2(%arg0: i32) -> (i32, i32) {
    %c0_i32 = arith.constant 0 : i32
    %c0_i32_0 = arith.constant 0 : i32
    %c0_i32_1 = arith.constant 0 : i32
    return %c0_i32, %c0_i32_0 : i32, i32
  }
  func.func @transform_3(%arg0: i32) -> (i32, i32) {
    %c0_i32 = arith.constant 0 : i32
    %c0_i32_0 = arith.constant 0 : i32
    %c0_i32_1 = arith.constant 0 : i32
    return %c0_i32, %c0_i32_0 : i32, i32
  }
  func.func @transform_4(%arg0: i32) -> (i32, i32) {
    %c0_i32 = arith.constant 0 : i32
    %c0_i32_0 = arith.constant 0 : i32
    %c0_i32_1 = arith.constant 0 : i32
    return %c0_i32, %c0_i32_0 : i32, i32
  }
  func.func @transform_5(%arg0: i32) -> (i32, i32) {
    %c0_i32 = arith.constant 0 : i32
    %c0_i32_0 = arith.constant 0 : i32
    %c0_i32_1 = arith.constant 0 : i32
    return %c0_i32, %c0_i32_0 : i32, i32
  }
  func.func @transform_6(%arg0: i32) -> (i32, i32) {
    %c0_i32 = arith.constant 0 : i32
    %c0_i32_0 = arith.constant 0 : i32
    %c0_i32_1 = arith.constant 0 : i32
    return %c0_i32, %c0_i32_0 : i32, i32
  }
  func.func @transform_7(%arg0: i32) -> (i32, i32) {
    %c0_i32 = arith.constant 0 : i32
    %c0_i32_0 = arith.constant 0 : i32
    return %arg0, %c0_i32 : i32, i32
  }
}

</mosaic_0001>

<bundles_post_ra>
// kernel: adversarial_classifier_forward.1
= control target key start
LH: loop header
LB: loop body
LE: loop exit
PB: predicated region body
PF: predicated region fallthrough
CT: control target
= control target key end

     0   :  { %vm139_vm0 = vcmask 1043456   ;;  %vm135_vm1 = vcmask 588800   ;;  %vm274_vm2 = vcmask 261120   ;;  %vm291_vm3 = vcmask 23552   ;;  %s559_s1 = inlined_call_operand.vmem [shape: bf16[200,128], index: 1, kind: input, shape index: {}]   ;;  %s560_s3 = inlined_call_operand.vmem [shape: bf16[128,32], index: 3, kind: input, shape index: {}]   ;;  %s561_s0 = inlined_call_operand.vmem [shape: f32[8,200], index: 0, kind: input, shape index: {}]   ;;  %s562_s2 = inlined_call_operand.vmem [shape: f32[1,128], index: 2, kind: input, shape index: {}]   ;;  %s563_s4 = inlined_call_operand.vmem [shape: f32[1,32], index: 4, kind: input, shape index: {}]   ;;  %s564_s6 = inlined_call_operand.vmem [shape: f32[1,3], index: 6, kind: input, shape index: {}]   ;;  %s565_s5 = inlined_call_operand.vmem [shape: bf16[32,3], index: 5, kind: input, shape index: {}]   ;;  %s566_s7 = inlined_call_operand.vmem [shape: f32[8,3], index: 7, kind: output, shape index: {}]  }
   0x1   :  { %v407_v0 = vld [vmem:[%s559_s1 + $0x38] sm:$0xff]  ;;  %v55_v1 = vld [vmem:[%s559_s1 + $0x60] sm:$0xf]  ;;  %v406_v3 = vld [vmem:[%s559_s1 + $0x30] sm:$0xff] }
   0x2   :  { %v109_v2 = vunpack.c.l.b16 %v55_v1  ;;  %143 = vmatpush.bf16.msra.mxu0 %v407_v0  ;;  %v419_v6 = vld [vmem:[%s560_s3 + $0x38] sm:$0xff]  ;;  %v405_v7 = vld [vmem:[%s559_s1 + $0x28] sm:$0xff]  ;;  %v418_v9 = vld [vmem:[%s560_s3 + $0x30] sm:$0xff] }
   0x3   :  { %v411_v8 = vld [vmem:[%s559_s1 + $0x58] sm:$0xff]  ;;  %239 = vmatpush.bf16.msra.mxu2 %v419_v6  ;;  %v404_v10 = vld [vmem:[%s559_s1 + $0x20] sm:$0xff]  ;;  %v410_v11 = vld [vmem:[%s559_s1 + $0x50] sm:$0xff] }
   0x4   :  { %v122_v4 = vpack.c.b16 %v109_v2, %v109_v2  ;;  %v417_v12 = vld [vmem:[%s560_s3 + $0x28] sm:$0xff]  ;;  %v403_v13 = vld [vmem:[%s559_s1 + $0x18] sm:$0xff]  ;;  %v416_v15 = vld [vmem:[%s560_s3 + $0x20] sm:$0xff] }
   0x5   :  { %v409_v14 = vld [vmem:[%s559_s1 + $0x48] sm:$0xff]  ;;  %v402_v16 = vld [vmem:[%s559_s1 + $0x10] sm:$0xff]  ;;  %v408_v17 = vld [vmem:[%s559_s1 + $0x40] sm:$0xff] }
   0x6   :  { %v141_v5 = vsel %vm139_vm0, %v122_v4, 0  ;;  %144 = vmatpush.bf16.msra.mxu0 %v406_v3  ;;  %v28_v18 = vld [vmem:[%s561_s0 + $0x8] sm:$0xff]  ;;  %v400_v21 = vld [vmem:[%s559_s1] sm:$0xff]  ;;  %v415_v24 = vld [vmem:[%s560_s3 + $0x18] sm:$0xff] }
   0x7   :  { %159 = vmatpush.bf16.msra.mxu1 %v141_v5  ;;  %240 = vmatpush.bf16.msra.mxu2 %v418_v9  ;;  %v30_v19 = vpack.c.bf16 %v28_v18, %v28_v18  ;;  %v401_v20 = vld [vmem:[%s559_s1 + $0x8] sm:$0xff]  ;;  %v27_v22 = vld [vmem:[%s561_s0] sm:$0xff]  ;;  %v414_v25 = vld [vmem:[%s560_s3 + $0x10] sm:$0xff] }
   0x8   :  { %v29_v23 = vpack.c.bf16 %v27_v22, %v27_v22  ;;  %v413_v26 = vld [vmem:[%s560_s3 + $0x8] sm:$0xff]  ;;  %v412_v27 = vld [vmem:[%s560_s3] sm:$0xff] }
   0x9   :  { %v422_v29 = vld [vmem:[%s562_s2] ss:$0 sm:$0xff]  ;;  %v421_v37 = vld [vmem:[%s565_s5 + $0x8] sm:$0xff] }
   0xa   :  { %145 = vmatpush.bf16.msra.mxu0 %v405_v7  ;;  %284 = vmatpush.bf16.msra.mxu3 %v421_v37  ;;  %v420_v38 = vld [vmem:[%s565_s5] sm:$0xff] }
   0xb   :  { %160 = vmatpush.bf16.msra.mxu1 %v411_v8  ;;  %241 = vmatpush.bf16.msra.mxu2 %v417_v12  ;;  %v423_v39 = vld [vmem:[%s563_s4] ss:$0 sm:$0xff] }
   0xc   :  { %v424_v45 = vld [vmem:[%s564_s6] ss:$0 sm:$0xff] }
   0xe   :  { %146 = vmatpush.bf16.msra.mxu0 %v404_v10  ;;  %285 = vmatpush.bf16.msra.mxu3 %v420_v38 }
   0xf   :  { %161 = vmatpush.bf16.msra.mxu1 %v410_v11  ;;  %242 = vmatpush.bf16.msra.mxu2 %v416_v15 }
  0x12   :  { %147 = vmatpush.bf16.msra.mxu0 %v403_v13 }
  0x13   :  { %162 = vmatpush.bf16.msra.mxu1 %v409_v14  ;;  %243 = vmatpush.bf16.msra.mxu2 %v415_v24 }
  0x16   :  { %148 = vmatpush.bf16.msra.mxu0 %v402_v16 }
  0x17   :  { %163 = vmatpush.bf16.msra.mxu1 %v408_v17  ;;  %244 = vmatpush.bf16.msra.mxu2 %v414_v25 }
  0x1a   :  { %358 = vmatmul.msk.bf16.vlgmr.msra.gmra.mxu1 %vm135_vm1, %v30_v19  ;;  %149 = vmatpush.bf16.msra.mxu0 %v401_v20 }
  0x1b   :  { %245 = vmatpush.bf16.msra.mxu2 %v413_v26 }
  0x1e   :  { %150 = vmatpush.bf16.msra.mxu0 %v400_v21 }
  0x1f   :  { %246 = vmatpush.bf16.msra.mxu2 %v412_v27 }
  0x21   :  { %151 = vmatmul.bf16.vlgmr.msra.gmra.mxu0 %v29_v23 }
  0x97   :  { %v165_v28 = vpop.f32.mrf.mxu1 }
  0x9e   :  { %v152_v30 = vpop.f32.mrf.mxu0 }
  0x9f   :  { %v167_v31 = vpop.f32.mrf.mxu1  ;;  %v153_v32 = vadd.f32 %v422_v29, %v152_v30 }
  0xa1   :  { %v166_v33 = vadd.f32 %v165_v28, %v153_v32 }
  0xa3   :  { %v169_v34 = vmax.f32 %v166_v33, 0.0 }
  0xa5   :  { %v170_v35 = vpack.c.bf16 %v169_v34, %v169_v34 }
  0xa6   :  { %v154_v36 = vpop.f32.mrf.mxu0 }
  0xa7   :  { %247 = vmatmul.bf16.vlgmr.msra.gmra.mxu2 %v170_v35 }
 0x12a   :  { %v248_v40 = vpop.f32.mrf.mxu2 }
 0x12b   :  { %v249_v41 = vadd.f32 %v423_v39, %v248_v40 }
 0x12d   :  { %v252_v42 = vmax.f32 %v249_v41, 0.0 }
 0x12f   :  { %v253_v43 = vpack.c.bf16 %v252_v42, %v252_v42 }
 0x131   :  { %399 = vmatmul.msk.bf16.vlgmr.msra.gmra.mxu3 %vm274_vm2, %v253_v43 }
 0x132   :  { %v250_v44 = vpop.f32.mrf.mxu2 }
 0x1b4   :  { %v287_v46 = vpop.f32.mrf.mxu3 }
 0x1b5   :  { %v288_v47 = vadd.f32 %v424_v45, %v287_v46 }
 0x1b7   :  { %v292_v48 = vsel %vm291_vm3, %v288_v47, -inf }
 0x1b8   :  { %293 = vmax.xlane.f32.xlu0 %v292_v48 }
 0x1bc   :  { %v289_v49 = vpop.f32.mrf.mxu3 }
 0x22b   :  { %v294_v50 = vpop.xlane.xlu0 %293 }
 0x22c   :  { %v295_v51 = vsub.f32 %v288_v47, %v294_v50 }
 0x22e   :  { %v296_v52 = vmul.f32 1.442695, %v295_v51 }
 0x230   :  { %425 = vpow2.f32 %v296_v52 }
 0x236   :  { %v426_v53 = vpop.eup %425 }
 0x237   :  { %v298_v54 = vsel %vm291_vm3, %v426_v53, 0.0 }
 0x238   :  { %299 = vadd.xlane.f32.xlu0 %v298_v54 }
 0x2ab   :  { %v300_v55 = vpop.xlane.xlu0 %299 }
 0x2ac   :  { %427 = vlog2.f32 %v300_v55 }
 0x2b2   :  { %v428_v56 = vpop.eup %427 }
 0x2b3   :  { %v302_v57 = vmul.f32 0.6931472, %v428_v56 }
 0x2b5   :  { %v303_v58 = vadd.f32 %v302_v57, %v294_v50 }
 0x2b7   :  { %v304_v59 = vsub.f32 %v288_v47, %v303_v58 }
 0x2b9   :  { %305 = vst.msk [vmem:[%s566_s7] sm:$0xff] %vm291_vm3, %v304_v59 }

</bundles_post_ra>
